<compile_context>
chip_gen: v6e
topology: v6e:2x2x1
jax: 0.10.0
libtpu: 0.0.40
codegen_flags: <defaults>
</compile_context>

<pallas_src>
import functools
from typing import List, Tuple

import jax
import jax.numpy as jnp
from jax.experimental import pallas as pl
from jax.experimental.pallas import tpu as pltpu

_SUBLANE = 8  # f32 accumulator sublane granularity


def _round_up(x: int, m: int) -> int:
    return ((x + m - 1) // m) * m


def _vmem_budgets() -> Tuple[int, int, int]:
    """Return (col_budget_bytes, vmem_limit_bytes, tm_cap), generation aware."""
    cap = None
    try:
        info = pltpu.get_tpu_info()
        cap = int(getattr(info, "vmem_capacity_bytes", 0)) or None
    except Exception:
        cap = None
    if cap is None:
        cap = 64 << 20  # unknown chip: assume the smallest (v7x-sized) VMEM
    if cap <= (64 << 20):
        # v7x: 64 MiB per TensorCore, 2 TCs/chip -> stay conservative.
        return 24 << 20, 44 << 20, 2048
    # v5e / v6e: 128 MiB physical VMEM.  (v5e's scoped default is only
    # 16 MiB, so the explicit vmem_limit_bytes matters there.)
    return 56 << 20, 96 << 20, 4096


def _pick_tm(m: int, cin: int, cout_p: int, itemsize: int, *,
             col_budget_bytes: int, tm_cap: int, resident_bytes: int) -> int:
    """Largest pixel tile (multiple of 128) whose working set fits the budget."""
    budget = max(col_budget_bytes - resident_bytes, 1 << 20)
    # Per pixel column: double-buffered x block + double-buffered output
    # blocks + the f32 accumulator (counted once).
    per_col = 2 * cin * itemsize + 2 * cout_p * itemsize + 4 * cout_p
    tm = budget // max(per_col, 1)
    tm = min(tm, tm_cap, _round_up(m, 128))
    tm = max(128, (tm // 128) * 128)
    return int(tm)


def _cblinear_kernel(x_ref, w_ref, b_ref, *o_refs, split_sizes, padded_offsets):
    # x_ref: (C_in, tm)   w_ref: (C_out_p, C_in)   b_ref: (C_out_p, 1)
    # o_refs[i]: (split_sizes[i], tm)
    #
    # NOTE: correctness of the ragged last pixel block relies on the
    # contraction being over C_in (sublanes) only -- garbage in padded lanes
    # never mixes into valid output lanes.  Do not add lane-axis reductions.
    acc = jnp.dot(w_ref[...], x_ref[...], preferred_element_type=jnp.float32)
    acc = acc + b_ref[...].astype(jnp.float32)
    for o_ref, oc, off in zip(o_refs, split_sizes, padded_offsets):
        # `off` is a multiple of 8 -> sublane-aligned slice, dense store.
        o_ref[...] = acc[off:off + oc, :].astype(o_ref.dtype)


def _resident_spec(shape):
    """Single-buffered BlockSpec for a grid-invariant (resident) operand."""
    idx = lambda b, i: (0,) * len(shape)
    try:
        return pl.BlockSpec(shape, idx, pipeline_mode=pl.Buffered(1))
    except TypeError:
        # Older JAX without pipeline_mode: fall back to default buffering.
        return pl.BlockSpec(shape, idx)


def _cblinear_split_matmul(x3d: jax.Array, w2d: jax.Array, b2d: jax.Array,
                           split_sizes, padded_offsets, *,
                           tm: int, vmem_limit_bytes: int):
    """x3d: (N, C_in, M), w2d: (C_out_p, C_in), b2d: (C_out_p, 1)
       -> tuple of (N, oc, M) for oc in split_sizes."""
    n, cin, m = x3d.shape
    cout_p = w2d.shape[0]
    cout = int(sum(split_sizes))
    itemsize = jnp.dtype(x3d.dtype).itemsize

    grid = (n, pl.cdiv(m, tm))
    kernel = functools.partial(_cblinear_kernel,
                               split_sizes=tuple(int(s) for s in split_sizes),
                               padded_offsets=tuple(int(o) for o in padded_offsets))

    out_shape = tuple(jax.ShapeDtypeStruct((n, oc, m), x3d.dtype)
                      for oc in split_sizes)
    in_specs = [
        pl.BlockSpec((None, cin, tm), lambda b, i: (b, 0, i)),   # x tile (C_in, tm)
        _resident_spec((cout_p, cin)),                           # weight (single-buffered)
        _resident_spec((cout_p, 1)),                             # bias   (single-buffered)
    ]
    out_specs = tuple(pl.BlockSpec((None, oc, tm), lambda b, i: (b, 0, i))
                      for oc in split_sizes)

    cost = pl.CostEstimate(
        flops=2 * n * cout_p * cin * m,
        transcendentals=0,
        bytes_accessed=n * m * (cin + cout) * itemsize + cout_p * (cin + 1) * itemsize,
    )

    return pl.pallas_call(
        kernel,
        out_shape=out_shape,
        grid_spec=pltpu.PrefetchScalarGridSpec(
            num_scalar_prefetch=0,
            grid=grid,
            in_specs=in_specs,
            out_specs=out_specs,
        ),
        compiler_params=pltpu.CompilerParams(
            dimension_semantics=("parallel", "parallel"),
            vmem_limit_bytes=vmem_limit_bytes,
        ),
        cost_estimate=cost,
    )(x3d, w2d, b2d)


class CBLinearPallas:
    """JAX/Pallas equivalent of the PyTorch CBLinear module (kernel_size=1)."""

    def __init__(self, in_channels: int, out_channels: List[int], key: jax.Array):
        self.in_channels = in_channels
        self.out_channels = list(out_channels)
        cout = sum(out_channels)
        kw, kb = jax.random.split(key)
        # Master parameters match nn.Conv2d shapes: (Cout, Cin, 1, 1), (Cout,).
        fan_in = in_channels  # kernel_size = 1
        bound = 1.0 / (fan_in ** 0.5)
        self.weight = jax.random.uniform(
            kw, (cout, in_channels, 1, 1), jnp.float32, -bound, bound)
        self.bias = jax.random.uniform(kb, (cout,), jnp.float32, -bound, bound)

        # Sublane-aligned kernel layout: each split's weight/bias rows are
        # placed at an offset that is a multiple of 8, so accumulator slices
        # in the kernel never start mid-sublane.
        poff, off = [], 0
        for oc in self.out_channels:
            poff.append(off)
            off += _round_up(oc, _SUBLANE)
        self.padded_offsets = tuple(poff)
        self.cout_padded = off

        w2d = self.weight.reshape(cout, in_channels)
        w_p = jnp.zeros((self.cout_padded, in_channels), jnp.float32)
        b_p = jnp.zeros((self.cout_padded,), jnp.float32)
        s = 0
        for oc, po in zip(self.out_channels, self.padded_offsets):
            w_p = w_p.at[po:po + oc].set(w2d[s:s + oc])
            b_p = b_p.at[po:po + oc].set(self.bias[s:s + oc])
            s += oc
        self._w_padded_f32 = w_p
        self._b_padded_f32 = b_p.reshape(self.cout_padded, 1)
        self._param_cache = {}

    def _params_for(self, dtype):
        # Cast weights/bias to the activation dtype (native bf16 MXU path,
        # half the weight DMA); accumulation stays f32 inside the kernel.
        key = jnp.dtype(dtype).name
        if key not in self._param_cache:
            self._param_cache[key] = (self._w_padded_f32.astype(dtype),
                                      self._b_padded_f32.astype(dtype))
        return self._param_cache[key]

    def __call__(self, x: jax.Array) -> Tuple[jax.Array, ...]:
        # x: NCHW (like PyTorch).  Output dtype follows x (pass bf16 x for
        # halved HBM traffic); weights are cast to match, accumulation is f32.
        n, c, h, w = x.shape
        assert c == self.in_channels
        m = h * w
        itemsize = jnp.dtype(x.dtype).itemsize
        cout_p = self.cout_padded

        w2d, b2d = self._params_for(x.dtype)

        col_budget, vmem_limit, tm_cap = _vmem_budgets()
        # Resident (single-buffered) operands in VMEM layout: lanes padded to
        # 128, sublanes to 8.
        resident = (cout_p * _round_up(c, 128)
                    + _round_up(cout_p, _SUBLANE) * 128) * itemsize
        tm = _pick_tm(m, c, cout_p, itemsize,
                      col_budget_bytes=col_budget, tm_cap=tm_cap,
                      resident_bytes=resident)

        # Small-input megacore fix: give v7x's second TensorCore blocks to run
        # (keeps tm >= 512; free on single-TC chips).
        while n * pl.cdiv(m, tm) < 4 and tm >= 1024:
            tm = max(512, ((tm // 2) // 128) * 128)

        # Sanity check: resident + double-buffered tiles + f32 acc must fit
        # under the scoped VMEM limit we request.
        per_col = 2 * c * itemsize + 2 * cout_p * itemsize + 4 * cout_p
        assert resident + per_col * tm < vmem_limit, (
            "CBLinear tile selection exceeds the VMEM limit")

        x3d = x.reshape(n, c, m)  # NCHW -> (N, C_in, H*W): free reshape, no transpose
        outs3d = _cblinear_split_matmul(
            x3d, w2d, b2d, self.out_channels, self.padded_offsets,
            tm=tm, vmem_limit_bytes=vmem_limit)

        # (N, oc, H*W) -> (N, oc, H, W): free reshapes; split done in-kernel.
        return tuple(o.reshape(n, oc, h, w)
                     for o, oc in zip(outs3d, self.out_channels))


if __name__ == "__main__":
    key = jax.random.PRNGKey(0)
    k_param, k_x = jax.random.split(key)

    batch, in_channels, spatial = 2, 4, 16
    out_channels = [4, 8, 16]

    module = CBLinearPallas(in_channels, out_channels, k_param)
    x = jax.random.normal(k_x, (batch, in_channels, spatial, spatial), jnp.float32)

    outs = module(x)
    outs = jax.block_until_ready(outs)

    # Reference check against plain-JAX 1x1 conv (lax.conv) semantics.
    w = module.weight
    b = module.bias
    y_ref = jax.lax.conv_general_dilated(
        x, w, window_strides=(1, 1), padding="VALID",
        dimension_numbers=("NCHW", "OIHW", "NCHW")) + b[None, :, None, None]
    start = 0
    ok = True
    for oc, o in zip(out_channels, outs):
        ref_slice = y_ref[:, start:start + oc]
        start += oc
        ok &= o.shape == ref_slice.shape
        ok &= bool(jnp.allclose(o, ref_slice, atol=1e-5, rtol=1e-5))
    assert ok, "mismatch vs reference 1x1 conv"

    print("KERNEL_OK")
</pallas_src>

<mosaic_0001>
module attributes {stable_mosaic.version = 11 : i64} {
  func.func @_cblinear_kernel(%arg0: i32, %arg1: i32, %arg2: memref<1x4x256xf32, #tpu.memory_space<vmem>>, %arg3: memref<32x4xf32, #tpu.memory_space<vmem>>, %arg4: memref<32x1xf32, #tpu.memory_space<vmem>>, %arg5: memref<1x4x256xf32, #tpu.memory_space<vmem>>, %arg6: memref<1x8x256xf32, #tpu.memory_space<vmem>>, %arg7: memref<1x16x256xf32, #tpu.memory_space<vmem>>) attributes {dimension_semantics = [#tpu.dimension_semantics<parallel>, #tpu.dimension_semantics<parallel>], iteration_bounds = array<i64: 2, 1>, scalar_prefetch = 0 : i64, scratch_operands = 0 : i64, tpu.core_type = #tpu.core_type<tc>, window_params = [{transform_indices = @transform_0, window_bounds = array<i64: 1, 4, 256>}, {pipeline_mode = #tpu.pipeline_mode<synchronous>, transform_indices = @transform_1, window_bounds = array<i64: 32, 4>}, {pipeline_mode = #tpu.pipeline_mode<synchronous>, transform_indices = @transform_2, window_bounds = array<i64: 32, 1>}, {transform_indices = @transform_3, window_bounds = array<i64: 1, 4, 256>}, {transform_indices = @transform_4, window_bounds = array<i64: 1, 8, 256>}, {transform_indices = @transform_5, window_bounds = array<i64: 1, 16, 256>}]} {
    %c0 = arith.constant 0 : index
    %c0_0 = arith.constant 0 : index
    %0 = vector.load %arg3[%c0, %c0_0] : memref<32x4xf32, #tpu.memory_space<vmem>>, vector<32x4xf32>
    %c0_1 = arith.constant 0 : index
    %c0_2 = arith.constant 0 : index
    %c0_3 = arith.constant 0 : index
    %1 = vector.load %arg2[%c0_1, %c0_2, %c0_3] : memref<1x4x256xf32, #tpu.memory_space<vmem>>, vector<1x4x256xf32>
    %2 = vector.shape_cast %1 : vector<1x4x256xf32> to vector<4x256xf32>
    %cst = arith.constant dense<0.000000e+00> : vector<32x256xf32>
    %3 = tpu.matmul %0, %2, %cst {dimension_numbers = #tpu.dot_dimension_numbers<[1], [0], [0], [1], [0, 0, 1, 1], [], []>} : vector<32x4xf32>, vector<4x256xf32>, vector<32x256xf32> -> vector<32x256xf32>
    %c0_4 = arith.constant 0 : index
    %c0_5 = arith.constant 0 : index
    %4 = vector.load %arg4[%c0_4, %c0_5] : memref<32x1xf32, #tpu.memory_space<vmem>>, vector<32x1xf32>
    %5 = vector.broadcast %4 : vector<32x1xf32> to vector<32x256xf32>
    %6 = arith.addf %3, %5 : vector<32x256xf32>
    %7 = vector.extract_strided_slice %6 {offsets = [0, 0], sizes = [4, 256], strides = [1, 1]} : vector<32x256xf32> to vector<4x256xf32>
    %c0_6 = arith.constant 0 : index
    %c0_7 = arith.constant 0 : index
    %c0_8 = arith.constant 0 : index
    %8 = vector.load %arg5[%c0_6, %c0_7, %c0_8] : memref<1x4x256xf32, #tpu.memory_space<vmem>>, vector<1x4x256xf32>
    %9 = vector.shape_cast %8 : vector<1x4x256xf32> to vector<4x256xf32>
    %10 = vector.shape_cast %7 : vector<4x256xf32> to vector<1x4x256xf32>
    tpu.vector_store %arg5[%c0_6, %c0_7, %c0_8], %10 {strides = array<i32>} : memref<1x4x256xf32, #tpu.memory_space<vmem>>, vector<1x4x256xf32>,
    %11 = vector.extract_strided_slice %6 {offsets = [8, 0], sizes = [8, 256], strides = [1, 1]} : vector<32x256xf32> to vector<8x256xf32>
    %c0_9 = arith.constant 0 : index
    %c0_10 = arith.constant 0 : index
    %c0_11 = arith.constant 0 : index
    %12 = vector.load %arg6[%c0_9, %c0_10, %c0_11] : memref<1x8x256xf32, #tpu.memory_space<vmem>>, vector<1x8x256xf32>
    %13 = vector.shape_cast %12 : vector<1x8x256xf32> to vector<8x256xf32>
    %14 = vector.shape_cast %11 : vector<8x256xf32> to vector<1x8x256xf32>
    tpu.vector_store %arg6[%c0_9, %c0_10, %c0_11], %14 {strides = array<i32>} : memref<1x8x256xf32, #tpu.memory_space<vmem>>, vector<1x8x256xf32>,
    %15 = vector.extract_strided_slice %6 {offsets = [16, 0], sizes = [16, 256], strides = [1, 1]} : vector<32x256xf32> to vector<16x256xf32>
    %c0_12 = arith.constant 0 : index
    %c0_13 = arith.constant 0 : index
    %c0_14 = arith.constant 0 : index
    %16 = vector.load %arg7[%c0_12, %c0_13, %c0_14] : memref<1x16x256xf32, #tpu.memory_space<vmem>>, vector<1x16x256xf32>
    %17 = vector.shape_cast %16 : vector<1x16x256xf32> to vector<16x256xf32>
    %18 = vector.shape_cast %15 : vector<16x256xf32> to vector<1x16x256xf32>
    tpu.vector_store %arg7[%c0_12, %c0_13, %c0_14], %18 {strides = array<i32>} : memref<1x16x256xf32, #tpu.memory_space<vmem>>, vector<1x16x256xf32>,
    return
  }
  func.func @transform_0(%arg0: i32, %arg1: i32) -> (i32, i32, i32) {
    %c0_i32 = arith.constant 0 : i32
    %c0_i32_0 = arith.constant 0 : i32
    return %arg0, %c0_i32, %arg1 : i32, i32, i32
  }
  func.func @transform_1(%arg0: i32, %arg1: i32) -> (i32, i32) {
    %c0_i32 = arith.constant 0 : i32
    %c0_i32_0 = arith.constant 0 : i32
    %c0_i32_1 = arith.constant 0 : i32
    return %c0_i32, %c0_i32_0 : i32, i32
  }
  func.func @transform_2(%arg0: i32, %arg1: i32) -> (i32, i32) {
    %c0_i32 = arith.constant 0 : i32
    %c0_i32_0 = arith.constant 0 : i32
    %c0_i32_1 = arith.constant 0 : i32
    return %c0_i32, %c0_i32_0 : i32, i32
  }
  func.func @transform_3(%arg0: i32, %arg1: i32) -> (i32, i32, i32) {
    %c0_i32 = arith.constant 0 : i32
    %c0_i32_0 = arith.constant 0 : i32
    return %arg0, %c0_i32, %arg1 : i32, i32, i32
  }
  func.func @transform_4(%arg0: i32, %arg1: i32) -> (i32, i32, i32) {
    %c0_i32 = arith.constant 0 : i32
    %c0_i32_0 = arith.constant 0 : i32
    return %arg0, %c0_i32, %arg1 : i32, i32, i32
  }
  func.func @transform_5(%arg0: i32, %arg1: i32) -> (i32, i32, i32) {
    %c0_i32 = arith.constant 0 : i32
    %c0_i32_0 = arith.constant 0 : i32
    return %arg0, %c0_i32, %arg1 : i32, i32, i32
  }
}

</mosaic_0001>

<bundles_post_ra>
// kernel: tpu_custom_call.1
= control target key start
LH: loop header
LB: loop body
LE: loop exit
PB: predicated region body
PF: predicated region fallthrough
CT: control target
= control target key end

     0   :  { %s1131_s0 = inlined_call_operand.vmem [shape: f32[2,4,256], index: 0, kind: input, shape index: {}]   ;;  %s1132_s1 = inlined_call_operand.vmem [shape: f32[32,4], index: 1, kind: input, shape index: {}]   ;;  %s1133_s2 = inlined_call_operand.vmem [shape: f32[32,1], index: 2, kind: input, shape index: {}]   ;;  %s1134_s3 = inlined_call_operand.hbm [shape: f32[2,4,256], index: 3, kind: output, shape index: {0}]   ;;  %s1135_s4 = inlined_call_operand.hbm [shape: f32[2,8,256], index: 4, kind: output, shape index: {1}]   ;;  %s1136_s5 = inlined_call_operand.hbm [shape: f32[2,16,256], index: 5, kind: output, shape index: {2}]  }
   0x1   :  { %1138 = sst [smem:[#allocation9_spill]] %s1131_s0 }
   0x2   :  { %1139 = sst [smem:[#allocation10_spill]] %s1132_s1 }
   0x3   :  { %1140 = sst [smem:[#allocation11_spill]] %s1133_s2 }
   0x4   :  { %11 = vsyncpa [#allocation3], 0 }
   0x5   :  { %13 = vsyncpa [#allocation3 + $0x1], 0 }
   0x6   :  { %14 = vsyncpa [#allocation5], 0 }
   0x7   :  { %16 = vsyncpa [#allocation5 + $0x1], 0  ;;  %s907_s18 = smov 0   ;;  %s909_s19 = smov 0  }
   0x8   :  { %s911_s20 = smov 0   ;;  %s913_s21 = smov 0  }
   0x9   :  { %s915_s22 = smov 0   ;;  %s917_s23 = smov 0  }
   0xa LB: > { %s631_s24 = sadd.s32 4294967295, %s868_s23   ;;  %s1137_s25 = sadd.s32 4294967294, %s868_s23   ;;  %s868_s23 = sphi %s917_s23, %s22_s23   ;;  %s864_s22 = sphi %s915_s22, %s1151_s22   ;;  %s860_s21 = sphi %s913_s21, %s1150_s21   ;;  %s856_s20 = sphi %s911_s20, %s1149_s20   ;;  %s852_s19 = sphi %s909_s19, %s1148_s19   ;;  %s848_s18 = sphi %s907_s18, %s1147_s18  }
   0xb   : > { %s34_s26 = sadd.s32 1, %s864_s22  ;;  %s113_s27 = sadd.s32 1, %s856_s20 }
   0xc   : > { %p36_p0 = scmp.ge.s32.totalorder %s34_s26, 2  ;;  %p123_p1 = scmp.ne.s32.totalorder %s856_s20, %s852_s19 }
   0xd   : > { %p124_p2 = scmp.eq.s32.totalorder %s631_s24, 1  ;;  %p129_p3 = scmp.ne.s32.totalorder %s852_s19, %s848_s18 }
   0xe   : > { %s1153_s26 = smov (%p36_p0, %s34_s26), 0  ;;  %p130_p5 = scmp.eq.s32.totalorder %s1137_s25, 1 }
   0xf   : > { %p949_p4 = por %p124_p2, %p123_p1  ;;  %s108_s29 = ssub.s32 %s864_s22, %s1153_s26 }
  0x10   : > { %p635_p6 = scmp.ge.s32.totalorder %s868_s23, 1  ;;  %p111_p7 = scmp.eq.s32.totalorder %s108_s29, 0 }
  0x11   : > { %p958_p8 = por %p130_p5, %p129_p3  ;;  %p223_p9 = scmp.lt.s32.totalorder %s868_s23, 3 }
  0x12   : > { %s964_s6 = scalar_select %p111_p7, %s856_s20, %s113_s27  }
  0x13   : > { %p224_p10 = pnand %p635_p6, %p223_p9 }
  0x14   : > { %p266_p11 = scmp.lt.s32.totalorder (!%p224_p10), %s860_s21, 1  ;;  %s1143_s2 = sld [smem:[#allocation11_spill]] (!%p224_p10) }
  0x15   : > { %227 = sbr.rel (%p224_p10) target bundleno = 293 (0x125), region = 32  ;;  %s1144_s0 = sld [smem:[#allocation9_spill]] (!%p224_p10) }
  0x16   : > { %s1145_s1 = sld [smem:[#allocation10_spill]] (!%p224_p10)  ;;  %s996_s15 = sand.u32 (!%p224_p10), 1, %s852_s19  }
  0x17   : > { %s638_s16 = sshll.u32 (!%p224_p10), %s996_s15, 5  ;;  %s636_s7 = sshll.u32 (!%p224_p10), %s996_s15, 3 }
  0x18   : > { %s999_s17 = scalar_lea.vmem (!%p224_p10), [#allocation6], %s638_s16  ;;  %s1006_s8 = sand.u32 (!%p224_p10), 1, %s631_s24  }
  0x19   : > { %s485_s27 = sshll.u32 (!%p224_p10), %s999_s17, 4  ;;  %s659_s10 = sshll.u32 (!%p224_p10), %s860_s21, 7  ;;  %s1008_s27 = int_to_ptr.vmem [resolvable:$true] %s485_s27 }
  0x1a   : > { %v870_v0 = vmov 0.0   ;;  %v283_v1 = vld [vmem:[%s1143_s2] sm:$0xff]  ;;  %s267_s9 = scalar_select %p266_p11, %s860_s21, 1  ;;  %v871_v2 = vmov 0   ;;  %v285_v3 = vld [vmem:[%s1143_s2 + $0x10] sm:$0xff]  ;;  %v284_v4 = vld [vmem:[%s1143_s2 + $0x8] sm:$0xff] }
  0x1b   : > { %391 = vmatprep.mubr.f32.mxu0 %v870_v0  ;;  %403 = vmatprep.mubr.f32.mxu1 %v870_v0  ;;  %v286_v5 = vld [vmem:[%s1143_s2 + $0x18] sm:$0xff]  ;;  %vm322_vm0 = vcmask 1043456   ;;  %vm309_vm1 = vcmask 31744   ;;  %s250_s11 = scalar_lea.vmem [#allocation2], %s636_s7  ;;  %s661_s14 = sshll.u32 %s860_s21, 9 }
  0x1c   : > { %733 = vset.pattern.permute.xlu0 %v871_v2  ;;  %734 = vset.pattern.permute.xlu1 %v871_v2  ;;  %s658_s12 = sshll.u32 %s267_s9, 3  ;;  %v278_v8 = vld [vmem:[%s1145_s1] sm:$0xff]  ;;  %v280_v9 = vld [vmem:[%s1145_s1 + $0x10] sm:$0xff]  ;;  %v279_v10 = vld [vmem:[%s1145_s1 + $0x8] sm:$0xff]  ;;  %s660_s9 = sshll.u32 %s860_s21, 8 }
  0x1d   : > { %289 = vperm.xlu0 %733, %v283_v1   ;;  %299 = vperm.xlu1 %734, %v285_v3   ;;  %s273_s29 = scalar_lea.vmem %s1144_s0, %s658_s12  ;;  %v281_v11 = vld [vmem:[%s1145_s1 + $0x18] sm:$0xff]  ;;  %s454_s12 = sshll.u32 %s250_s11, 4  ;;  %s1028_s12 = int_to_ptr.vmem [resolvable:$true] %s454_s12 }
  0x1e   : > { %v282_v6 = vld [vmem:[%s273_s29] sm:$0xff]  ;;  %s637_s29 = sshll.u32 %s996_s15, 4  ;;  %s1020_s0 = scalar_lea.hbm %s1135_s4, %s660_s9 }
  0x1f   : > { %v308_v7 = vcombine.high %v282_v6, %v282_v6  ;;  %s1013_s24 = scalar_lea.vmem [#allocation4], %s637_s29  ;;  %s1026_s1 = scalar_lea.hbm %s1134_s3, %s659_s10 }
  0x20   : > { %s470_s13 = sshll.u32 %s1013_s24, 4  ;;  %s1035_s9 = scalar_lea.hbm %s1136_s5, %s661_s14  ;;  %s1030_s13 = int_to_ptr.vmem [resolvable:$true] %s470_s13 }
  0x21   : > { %294 = vperm.xlu0 %733, %v284_v4   ;;  %304 = vperm.xlu1 %734, %v286_v5   ;;  %s428_s10 = scalar_lea.sflag [#allocation3], %s996_s15  ;;  %s736_s16 = scalar_lea.vmem %s1028_s12, 128 }
  0x22   : > { %641 = vmatprep.subr.msk.mxu0 %vm322_vm0, %v308_v7  ;;  %662 = vmatprep.subr.msk.mxu1 %vm322_vm0, %v308_v7  ;;  %p737_p12 = scmp.ne.s32.totalorder %s1028_s12, %s736_s16  ;;  %s872_s29 = smov [#allocation2]  }
  0x23   : > { %642 = vmatpush1.msk.msra.mxu0 %vm322_vm0, %v282_v6  ;;  %663 = vmatpush1.msk.msra.mxu1 %vm322_vm0, %v282_v6  ;;  %s740_s7 = sshll.u32 %s872_s29, 4  ;;  %s741_s7 = int_to_ptr.vmem [resolvable:$false] %s740_s7 }
  0x24   : > { %643 = vmatmul.mubr.msk.f32.vlgmr.msra.gmra.mxu0 %vm309_vm1, %v278_v8  ;;  %645 = vmatmul.mubr.msk.f32.vlgmr.msra.gmra.mxu1 %vm309_vm1, %v280_v9  ;;  %p738_p13 = pnand %p737_p12, %p949_p4  ;;  %s742_s2 = scalar_lea.vmem %s741_s7, 256 }
  0x25   : > { %397 = vmatprep.mubr.f32.mxu0 %v870_v0  ;;  %409 = vmatprep.mubr.f32.mxu1 %v870_v0  ;;  %p743_p1 = scmp.lt.s32.totalorder %s1028_s12, %s741_s7  ;;  %p744_p2 = scmp.lt.s32.totalorder %s742_s2, %s736_s16 }
  0x26   : > { %p739_p0 = pneg %p738_p13 }
  0x27   : > { %p745_p3 = por %p744_p2, %p743_p1 }
  0x28   : > { %644 = vmatmul.mubr.msk.f32.gmra.mxu0 %vm309_vm1, %v279_v10  ;;  %646 = vmatmul.mubr.msk.f32.gmra.mxu1 %vm309_vm1, %v281_v11 }
  0x29   : > { %p746_p5 = pnand %p745_p3, %p739_p0 }
  0x98   : > { %v300_v12 = vpop.permute.xlu1 %299  ;;  %v290_v13 = vpop.permute.xlu0 %289 }
  0x9c   : > { %v305_v17 = vpop.permute.xlu1 %304  ;;  %v295_v21 = vpop.permute.xlu0 %294 }
  0xe4   : > { %v393_v14 = vpop.f32.mrf.mxu0  ;;  %v405_v15 = vpop.f32.mrf.mxu1 }
  0xe5   : > { %v406_v16 = vadd.f32 %v405_v15, %v300_v12  ;;  %v394_v20 = vadd.f32 %v393_v14, %v290_v13 }
  0xe6   : > { %v395_v18 = vpop.f32.mrf.mxu0  ;;  %v407_v19 = vpop.f32.mrf.mxu1 }
  0xe7   : > { %423 = vst [vmem:[%s999_s17] sm:$0xff] %v406_v16  ;;  %v396_v22 = vadd.f32 %v395_v18, %v290_v13  ;;  %v408_v23 = vadd.f32 %v407_v19, %v300_v12 }
  0xe8   : > { %v399_v24 = vpop.f32.mrf.mxu0  ;;  %v411_v25 = vpop.f32.mrf.mxu1 }
  0xe9   : > { %v418_v26 = vcombine.low %v394_v20, %v396_v22  ;;  %424 = vst [vmem:[%s999_s17 + $0x8] sm:$0xff] %v408_v23  ;;  %v400_v27 = vadd.f32 %v399_v24, %v295_v21  ;;  %v412_v28 = vadd.f32 %v411_v25, %v305_v17 }
  0xea   : > { %v401_v29 = vpop.f32.mrf.mxu0  ;;  %v413_v30 = vpop.f32.mrf.mxu1 }
  0xeb   : > { %421 = vst [vmem:[%s1013_s24] sm:$0xff] %v400_v27  ;;  %425 = vst [vmem:[%s999_s17 + $0x10] sm:$0xff] %v412_v28  ;;  %v402_v31 = vadd.f32 %v401_v29, %v295_v21  ;;  %v414_v32 = vadd.f32 %v413_v30, %v305_v17 }
  0xec   : > { %420 = vst [vmem:[%s250_s11] sm:$0xff] %v418_v26 }
  0xed   : > { %749 = shalt.err (!%p746_p5)
}
  0xee   : > { %s750_s11 = scalar_lea.hbm %s1026_s1, 128  ;;  %s754_s21 = scalar_lea.hbm %s1134_s3, 256 }
  0xef   : > { %p751_p6 = scmp.ne.s32.totalorder %s1026_s1, %s750_s11  ;;  %p755_p10 = scmp.lt.s32.totalorder %s1026_s1, %s1134_s3 }
  0xf0   : > { %p756_p11 = scmp.lt.s32.totalorder %s754_s21, %s750_s11 }
  0xf1   : > { %p752_p7 = pnand %p751_p6, %p949_p4 }
  0xf2   : > { %p757_p12 = por %p756_p11, %p755_p10 }
  0xf3   : > { %p753_p9 = pneg %p752_p7 }
  0xf5   : > { %p758_p13 = pnand %p757_p12, %p753_p9 }
  0xf7   : > { %761 = shalt.err (!%p758_p13)
}
  0xf8   : > { %664 = dma.vmem_to_hbm [thread:$0]  (%p949_p4), %s1028_s12, 128, %s1026_s1, %s428_s10   ;;  %422 = vst [vmem:[%s1013_s24 + $0x8] sm:$0xff] %v402_v31  ;;  %426 = vst [vmem:[%s999_s17 + $0x18] sm:$0xff] %v414_v32 }
  0xf9   : > { %s433_s2 = scalar_lea.sflag [#allocation5], %s1006_s8  ;;  %s762_s16 = scalar_lea.vmem %s1030_s13, 256 }
  0xfa   : > { %p763_p0 = scmp.ne.s32.totalorder %s1030_s13, %s762_s16  ;;  %s873_s7 = smov [#allocation4]  }
  0xfb   : > { %s766_s11 = sshll.u32 %s873_s7, 4  ;;  %s767_s11 = int_to_ptr.vmem [resolvable:$false] %s766_s11 }
  0xfc   : > { %p764_p1 = pnand %p763_p0, %p949_p4  ;;  %s768_s15 = scalar_lea.vmem %s767_s11, 512 }
  0xfd   : > { %p769_p3 = scmp.lt.s32.totalorder %s1030_s13, %s767_s11  ;;  %p770_p5 = scmp.lt.s32.totalorder %s768_s15, %s762_s16 }
  0xfe   : > { %p765_p2 = pneg %p764_p1 }
  0xff   : > { %p771_p6 = por %p770_p5, %p769_p3 }
 0x101   : > { %p772_p7 = pnand %p771_p6, %p765_p2 }
 0x103   : > { %775 = shalt.err (!%p772_p7)
}
 0x104   : > { %s776_s1 = scalar_lea.hbm %s1020_s0, 256  ;;  %s780_s24 = scalar_lea.hbm %s1135_s4, 512 }
 0x105   : > { %p777_p9 = scmp.ne.s32.totalorder %s1020_s0, %s776_s1  ;;  %p781_p12 = scmp.lt.s32.totalorder %s1020_s0, %s1135_s4 }
 0x106   : > { %p782_p13 = scmp.lt.s32.totalorder %s780_s24, %s776_s1 }
 0x107   : > { %p778_p10 = pnand %p777_p9, %p949_p4 }
 0x108   : > { %p783_p0 = por %p782_p13, %p781_p12 }
 0x109   : > { %p779_p11 = pneg %p778_p10 }
 0x10b   : > { %p784_p1 = pnand %p783_p0, %p779_p11 }
 0x10d   : > { %787 = shalt.err (!%p784_p1)
}
 0x10e   : > { %665 = dma.vmem_to_hbm [thread:$0]  (%p949_p4), %s1030_s13, 256, %s1020_s0, %s433_s2  }
 0x10f   : > { %s788_s21 = scalar_lea.vmem %s1008_s27, 512  ;;  %s874_s25 = smov [#allocation6]  }
 0x110   : > { %p789_p2 = scmp.ne.s32.totalorder %s1008_s27, %s788_s21  ;;  %s792_s29 = sshll.u32 %s874_s25, 4  ;;  %s793_s29 = int_to_ptr.vmem [resolvable:$false] %s792_s29 }
 0x111   : > { %s794_s16 = scalar_lea.vmem %s793_s29, 1024  ;;  %p795_p6 = scmp.lt.s32.totalorder %s1008_s27, %s793_s29 }
 0x112   : > { %p790_p3 = pnand %p789_p2, %p949_p4  ;;  %p796_p7 = scmp.lt.s32.totalorder %s794_s16, %s788_s21 }
 0x114   : > { %p791_p5 = pneg %p790_p3  ;;  %p797_p9 = por %p796_p7, %p795_p6 }
 0x116   : > { %p798_p10 = pnand %p797_p9, %p791_p5 }
 0x118   : > { %801 = shalt.err (!%p798_p10)
}
 0x119   : > { %s802_s7 = scalar_lea.hbm %s1035_s9, 512  ;;  %s806_s11 = scalar_lea.hbm %s1136_s5, 1024 }
 0x11a   : > { %p803_p11 = scmp.ne.s32.totalorder %s1035_s9, %s802_s7  ;;  %p807_p0 = scmp.lt.s32.totalorder %s1035_s9, %s1136_s5 }
 0x11b   : > { %p808_p1 = scmp.lt.s32.totalorder %s806_s11, %s802_s7 }
 0x11c   : > { %p804_p12 = pnand %p803_p11, %p949_p4 }
 0x11d   : > { %p809_p2 = por %p808_p1, %p807_p0 }
 0x11e   : > { %p805_p13 = pneg %p804_p12 }
 0x120   : > { %p810_p3 = pnand %p809_p2, %p805_p13 }
 0x122   : > { %813 = shalt.err (!%p810_p3)
}
 0x123   : > { %s875_s17 = smov 256   ;;  %s876_s12 = smov 16  }
 0x124   : > { %666 = dma.vmem_to_hbm [thread:$0]  (%p949_p4), %s1008_s27, 512, %s1035_s9, %s433_s2, %s875_s17, %s875_s17, %s876_s12  }
 0x125 PF: > { %p680_p5 = scmp.ge.s32.totalorder %s868_s23, 2  ;;  %s500_s24 = sand.u32 1, %s848_s18  }
 0x126   : > { %s501_s10 = scalar_lea.sflag [#allocation3], %s500_s24 }
 0x127   : > { %p671_p6 = pnand %p680_p5, %p958_p8 }
 0x129   : > { %p672_p7 = pneg %p671_p6 }
 0x12b   : > { %839 = dma.done.wait (%p672_p7), %s501_s10, 128  }
 0x12c   : > { %841 = vsyncadd (%p672_p7), %s501_s10, 4294967168  ;;  %s1146_s14 = sadd.s32 4294967294, %s868_s23  }
 0x12d   : > { %s509_s21 = sand.u32 1, %s1146_s14  }
 0x12e   : > { %s510_s25 = scalar_lea.sflag [#allocation5], %s509_s21 }
 0x12f   : > { %843 = dma.done.wait (%p672_p7), %s510_s25, 768  }
 0x130   : > { %845 = vsyncadd (%p672_p7), %s510_s25, 4294966528  ;;  %s22_s23 = sadd.s32 1, %s868_s23   ;;  %s1147_s18 = smov %s852_s19 }
 0x131   : > { %p19_p4 = scmp.ge.s32.totalorder %s22_s23, 4   ;;  %s1148_s19 = smov %s856_s20 }
 0x132   : > { %s1149_s20 = smov %s964_s6  ;;  %s1150_s21 = smov %s864_s22 }
 0x133   : > { %s1151_s22 = smov %s1153_s26  ;;  %21 = sbr.rel (!%p19_p4) target bundleno = 10 (0xa), region = 99 }
 0x138   :  { %524 = vsyncpa [#allocation3], 1 }
 0x139   :  { %526 = vsyncpa [#allocation3 + $0x1], 1 }
 0x13a   :  { %527 = vsyncpa [#allocation5], 1 }
 0x13b   :  { %529 = vsyncpa [#allocation5 + $0x1], 1 }

</bundles_post_ra>
